<compile_context>
chip_gen: v6e
topology: v6e:2x2x1
jax: 0.10.0
libtpu: 0.0.40
codegen_flags: <defaults>
</compile_context>

<pallas_src>
import functools

import numpy as np
import jax
import jax.numpy as jnp
from jax.experimental import pallas as pl
from jax.experimental.pallas import tpu as pltpu


BN_EPS = 1e-5


# ----------------------------------------------------------------------------
# Pallas kernels
# ----------------------------------------------------------------------------
def conv_stage_kernel(x_ref, m_ref, b_ref, scale_ref, shift_ref,
                      y_ref, sum_ref, sq_ref, *, apply_input_bn):
    """Fused [prev-stage BN+ReLU] -> 3x3 conv (+bias) -> BN batch-stat partials.

    Lane-dense layout: channels interleaved with W on the lane axis.

    x_ref     : (1, H, W*Cin)        unpadded, pre-BN activations (f32)
    m_ref     : (3, W*Cin, W*Cout)   banded conv weights, one band per ky (bf16)
    b_ref     : (1, W*Cout)          W-tiled conv bias (f32)
    scale_ref : (1, W*Cin)           W-tiled folded BN scale of previous stage
    shift_ref : (1, W*Cin)           W-tiled folded BN shift of previous stage
    y_ref     : (1, H, W*Cout)       pre-BN conv output (f32)
    sum_ref   : (1, 1, W*Cout)       per-batch, per-(w,c) partial sum
    sq_ref    : (1, 1, W*Cout)       per-batch, per-(w,c) partial sum-of-squares
    """
    H = x_ref.shape[1]

    a = x_ref[0]                                        # (H, W*Cin) f32
    if apply_input_bn:
        # Previous stage's BatchNorm + ReLU fused into this conv's load path.
        # Applied to the *unpadded* activation, so no halo re-zeroing needed.
        a = jnp.maximum(a * scale_ref[...] + shift_ref[...], 0.0)

    # H-axis zero padding, in VMEM (tiny: two zero rows).
    zrow = jnp.zeros((1, a.shape[1]), jnp.float32)
    ap = jnp.concatenate([zrow, a, zrow], axis=0)       # (H+2, W*Cin)

    # 3x3 conv as three banded matmuls (one per ky).  The kx taps and the
    # W-axis zero padding are folded into the banded matrices m_ref[ky].
    # bf16 operands, f32 MXU accumulation; partials summed in f32 on the VPU.
    p = jnp.dot(ap[0:H].astype(jnp.bfloat16), m_ref[0],
                preferred_element_type=jnp.float32)
    p = p + jnp.dot(ap[1:H + 1].astype(jnp.bfloat16), m_ref[1],
                    preferred_element_type=jnp.float32)
    p = p + jnp.dot(ap[2:H + 2].astype(jnp.bfloat16), m_ref[2],
                    preferred_element_type=jnp.float32)
    acc = p + b_ref[...]                                # (H, W*Cout) f32

    y_ref[0] = acc                                      # unmasked lane-dense store

    # BatchNorm batch-statistic partials (f32): only the H (sublane) axis is
    # reduced in-kernel (cheap); the W/channel fold happens in XLA.
    sum_ref[0] = jnp.sum(acc, axis=0, keepdims=True)
    sq_ref[0] = jnp.sum(acc * acc, axis=0, keepdims=True)


def bn_relu_kernel(y_ref, scale_ref, shift_ref, o_ref):
    """Final fused per-channel affine (folded BatchNorm) + ReLU, lane-dense."""
    o_ref[...] = jnp.maximum(y_ref[...] * scale_ref[...] + shift_ref[...], 0.0)


# ----------------------------------------------------------------------------
# Pallas wrappers
# ----------------------------------------------------------------------------
def _banded_conv_matrices(w_hwio, W):
    """(3, W*Cin, W*Cout) bf16 banded matrices: conv3x3(pad=1) along W as matmul.

    M[ky, wi*Cin+ci, wo*Cout+co] = w[ky, wi-wo+1, ci, co]  (0 if out of band),
    so x_row @ M[ky] applies the ky-slice of the conv, including the W-axis
    zero padding (out-of-range taps are simply absent from the band).
    """
    Cin, Cout = w_hwio.shape[2], w_hwio.shape[3]
    S = np.zeros((3, W, W), np.float32)                 # S[kx, wi, wo]
    for kx in range(3):
        for wo in range(W):
            wi = wo + kx - 1
            if 0 <= wi < W:
                S[kx, wi, wo] = 1.0
    S = jnp.asarray(S)
    M = jnp.einsum('dpq,ydco->ypcqo', S, w_hwio)        # (3, W, Cin, W, Cout)
    return M.reshape(3, W * Cin, W * Cout).astype(jnp.bfloat16)


def conv_stage(x_flat, w_hwio, b, scale_in=None, shift_in=None):
    """One fused HBM pass: [prev BN+ReLU] -> conv3x3 + bias -> BN stat partials.

    x_flat: (N, H, W*Cin) unpadded pre-BN activations (lane-dense layout).
    Returns (y_flat (N, H, W*Cout), mean (Cout,), var (Cout,)).
    """
    N, H, WCin = x_flat.shape
    Cin, Cout = w_hwio.shape[2], w_hwio.shape[3]
    W = WCin // Cin
    WCout = W * Cout

    apply_input_bn = scale_in is not None
    if not apply_input_bn:
        scale_in = jnp.ones((Cin,), jnp.float32)
        shift_in = jnp.zeros((Cin,), jnp.float32)

    M = _banded_conv_matrices(w_hwio, W)                # (3, WCin, WCout) bf16
    b_t = jnp.tile(b, W).reshape(1, WCout)              # W-tiled bias
    sc_t = jnp.tile(scale_in, W).reshape(1, WCin)       # W-tiled BN scale/shift
    sh_t = jnp.tile(shift_in, W).reshape(1, WCin)

    kern = functools.partial(conv_stage_kernel, apply_input_bn=apply_input_bn)

    y, psum, psq = pl.pallas_call(
        kern,
        out_shape=(jax.ShapeDtypeStruct((N, H, WCout), jnp.float32),
                   jax.ShapeDtypeStruct((N, 1, WCout), jnp.float32),
                   jax.ShapeDtypeStruct((N, 1, WCout), jnp.float32)),
        grid=(N,),
        in_specs=[
            pl.BlockSpec((1, H, WCin), lambda n: (n, 0, 0)),
            pl.BlockSpec((3, WCin, WCout), lambda n: (0, 0, 0)),
            pl.BlockSpec((1, WCout), lambda n: (0, 0)),
            pl.BlockSpec((1, WCin), lambda n: (0, 0)),
            pl.BlockSpec((1, WCin), lambda n: (0, 0)),
        ],
        out_specs=(pl.BlockSpec((1, H, WCout), lambda n: (n, 0, 0)),
                   pl.BlockSpec((1, 1, WCout), lambda n: (n, 0, 0)),
                   pl.BlockSpec((1, 1, WCout), lambda n: (n, 0, 0))),
        compiler_params=pltpu.CompilerParams(
            dimension_semantics=("parallel",),
            vmem_limit_bytes=32 * 1024 * 1024),
    )(x_flat, M, b_t, sc_t, sh_t)

    # Fold (N, 1, W*Cout) partials -> per-channel training-mode BN stats (tiny).
    cnt = float(N * H * W)
    ch_sum = jnp.sum(psum.reshape(N, W, Cout), axis=(0, 1))
    ch_sq = jnp.sum(psq.reshape(N, W, Cout), axis=(0, 1))
    mean = ch_sum / cnt
    var = jnp.maximum(ch_sq / cnt - mean * mean, 0.0)   # clamp cancellation
    return y, mean, var


def bn_relu(y_flat, scale, shift, C):
    """Final BN(affine-folded)+ReLU on the lane-dense (N, H, W*C) activation."""
    N, H, WC = y_flat.shape
    W = WC // C
    sc_t = jnp.tile(scale, W).reshape(1, 1, WC)
    sh_t = jnp.tile(shift, W).reshape(1, 1, WC)
    return pl.pallas_call(
        bn_relu_kernel,
        out_shape=jax.ShapeDtypeStruct((N, H, WC), jnp.float32),
        grid=(N,),
        in_specs=[
            pl.BlockSpec((1, H, WC), lambda n: (n, 0, 0)),
            pl.BlockSpec((1, 1, WC), lambda n: (0, 0, 0)),
            pl.BlockSpec((1, 1, WC), lambda n: (0, 0, 0)),
        ],
        out_specs=pl.BlockSpec((1, H, WC), lambda n: (n, 0, 0)),
        compiler_params=pltpu.CompilerParams(
            dimension_semantics=("parallel",),
            vmem_limit_bytes=32 * 1024 * 1024),
    )(y_flat, sc_t, sh_t)


# ----------------------------------------------------------------------------
# JAX glue: gather-free bilinear x2 upsample (align_corners=True), pad, concat
# ----------------------------------------------------------------------------
def _interp_matrix_x2(n_in):
    """(2*n_in, n_in) bilinear interpolation matrix, align_corners=True."""
    n_out = 2 * n_in
    if n_in == 1:
        return jnp.ones((n_out, 1), jnp.float32)
    pos = np.arange(n_out, dtype=np.float64) * (n_in - 1) / (n_out - 1)
    lo = np.minimum(np.floor(pos).astype(np.int64), n_in - 1)
    hi = np.minimum(lo + 1, n_in - 1)
    frac = (pos - lo).astype(np.float32)
    m = np.zeros((n_out, n_in), np.float32)
    m[np.arange(n_out), lo] += 1.0 - frac
    m[np.arange(n_out), hi] += frac
    return jnp.asarray(m)


def bilinear_upsample_x2_align_corners(x_nhwc):
    """2x bilinear upsample as two small matmuls (no TPU gathers)."""
    mh = _interp_matrix_x2(x_nhwc.shape[1])              # (2H, H)
    mw = _interp_matrix_x2(x_nhwc.shape[2])              # (2W, W)
    x = jnp.einsum('oh,nhwc->nowc', mh, x_nhwc)
    x = jnp.einsum('pw,nowc->nopc', mw, x)
    return x


def _assemble_input(x1_nchw, x2_nchw):
    """NCHW -> NHWC, upsample x1, pad to x2's spatial size, concat channels."""
    x1 = jnp.transpose(x1_nchw, (0, 2, 3, 1)).astype(jnp.float32)
    x2 = jnp.transpose(x2_nchw, (0, 2, 3, 1)).astype(jnp.float32)
    x1 = bilinear_upsample_x2_align_corners(x1)
    diffY = x2.shape[1] - x1.shape[1]
    diffX = x2.shape[2] - x1.shape[2]
    x1 = jnp.pad(x1, ((0, 0),
                      (diffY // 2, diffY - diffY // 2),
                      (diffX // 2, diffX - diffX // 2),
                      (0, 0)))
    return jnp.concatenate([x2, x1], axis=-1)            # cat([x2, x1], dim=C)


@jax.jit
def up_forward(x1_nchw, x2_nchw, params):
    x = _assemble_input(x1_nchw, x2_nchw)                # (N, H, W, Cin)
    N, H, W, Cin = x.shape
    x_flat = x.reshape(N, H, W * Cin)                    # lane-dense, free reshape

    # ---- stage 1: conv1 + bias + BN1 batch stats in one fused pass ----------
    y1, mean1, var1 = conv_stage(x_flat, params["w1"], params["b1"])
    scale1 = params["gamma1"] / jnp.sqrt(var1 + BN_EPS)
    shift1 = params["beta1"] - mean1 * scale1

    # ---- stage 2: BN1+ReLU folded into conv2's load path, conv2 + BN2 stats -
    y2, mean2, var2 = conv_stage(y1, params["w2"], params["b2"],
                                 scale_in=scale1, shift_in=shift1)
    scale2 = params["gamma2"] / jnp.sqrt(var2 + BN_EPS)
    shift2 = params["beta2"] - mean2 * scale2

    # ---- final: BN2 + ReLU (needs global y2 stats -> one last pass) ---------
    Cout = params["w2"].shape[-1]
    out = bn_relu(y2, scale2, shift2, Cout)              # (N, H, W*Cout)
    out = out.reshape(N, H, W, Cout)
    return jnp.transpose(out, (0, 3, 1, 2))              # back to NCHW


# ----------------------------------------------------------------------------
# Pure-JAX reference (bf16 conv operands / f32 accumulate, like the kernels)
# ----------------------------------------------------------------------------
def _ref_conv_bn_relu(x, w, b, gamma, beta, eps=BN_EPS):
    y = jax.lax.conv_general_dilated(
        x.astype(jnp.bfloat16), w.astype(jnp.bfloat16),
        window_strides=(1, 1), padding=((1, 1), (1, 1)),
        dimension_numbers=("NHWC", "HWIO", "NHWC"),
        preferred_element_type=jnp.float32) + b[None, None, None, :]
    mean = jnp.mean(y, axis=(0, 1, 2))
    var = jnp.mean((y - mean) ** 2, axis=(0, 1, 2))
    yn = (y - mean) / jnp.sqrt(var + eps) * gamma + beta
    return jnp.maximum(yn, 0.0)


def _ref_forward(x1_nchw, x2_nchw, params):
    x = _assemble_input(x1_nchw, x2_nchw)
    y = _ref_conv_bn_relu(x, params["w1"], params["b1"],
                          params["gamma1"], params["beta1"])
    y = _ref_conv_bn_relu(y, params["w2"], params["b2"],
                          params["gamma2"], params["beta2"])
    return jnp.transpose(y, (0, 3, 1, 2))


# ----------------------------------------------------------------------------
# main
# ----------------------------------------------------------------------------
if __name__ == "__main__":
    key = jax.random.PRNGKey(0)
    k_w1, k_b1, k_w2, k_b2, k_x1, k_x2 = jax.random.split(key, 6)

    # Up(in_channels=8, out_channels=8, bilinear=True)
    c1 = 4                 # channels of x1 (to be upsampled)
    c2 = 4                 # channels of x2 (skip connection)
    in_channels = c1 + c2  # 8
    out_channels = 8

    params = {
        "w1": jax.random.normal(k_w1, (3, 3, in_channels, out_channels),
                                jnp.float32) * 0.1,
        "b1": jax.random.normal(k_b1, (out_channels,), jnp.float32) * 0.1,
        "gamma1": jnp.ones((out_channels,), jnp.float32),
        "beta1": jnp.zeros((out_channels,), jnp.float32),
        "w2": jax.random.normal(k_w2, (3, 3, out_channels, out_channels),
                                jnp.float32) * 0.1,
        "b2": jax.random.normal(k_b2, (out_channels,), jnp.float32) * 0.1,
        "gamma2": jnp.ones((out_channels,), jnp.float32),
        "beta2": jnp.zeros((out_channels,), jnp.float32),
    }

    # Inputs in PyTorch NCHW convention.
    x1 = jax.random.normal(k_x1, (2, c1, 8, 8), jnp.float32)     # low-res feat
    x2 = jax.random.normal(k_x2, (2, c2, 16, 16), jnp.float32)   # skip feat

    out = jax.block_until_ready(up_forward(x1, x2, params))
    ref = jax.block_until_ready(_ref_forward(x1, x2, params))

    assert out.shape == (2, out_channels, 16, 16)
    # bf16 matmul operands (precision choice), hence 1e-2 tolerance vs bf16 ref.
    assert jnp.max(jnp.abs(out - ref)) < 1e-2
    print("KERNEL_OK")
</pallas_src>

<mosaic_0001>
module attributes {stable_mosaic.version = 11 : i64} {
  func.func @conv_stage_kernel(%arg0: i32, %arg1: memref<1x16x128xf32, #tpu.memory_space<vmem>>, %arg2: memref<3x128x128xbf16, #tpu.memory_space<vmem>>, %arg3: memref<1x128xf32, #tpu.memory_space<vmem>>, %arg4: memref<1x128xf32, #tpu.memory_space<vmem>>, %arg5: memref<1x128xf32, #tpu.memory_space<vmem>>, %arg6: memref<1x16x128xf32, #tpu.memory_space<vmem>>, %arg7: memref<1x1x128xf32, #tpu.memory_space<vmem>>, %arg8: memref<1x1x128xf32, #tpu.memory_space<vmem>>) attributes {dimension_semantics = [#tpu.dimension_semantics<parallel>], iteration_bounds = array<i64: 2>, scalar_prefetch = 0 : i64, scratch_operands = 0 : i64, tpu.core_type = #tpu.core_type<tc>, window_params = [{transform_indices = @transform_0, window_bounds = array<i64: 1, 16, 128>}, {pipeline_mode = #tpu.pipeline_mode<synchronous>, transform_indices = @transform_1, window_bounds = array<i64: 3, 128, 128>}, {pipeline_mode = #tpu.pipeline_mode<synchronous>, transform_indices = @transform_2, window_bounds = array<i64: 1, 128>}, {pipeline_mode = #tpu.pipeline_mode<synchronous>, transform_indices = @transform_3, window_bounds = array<i64: 1, 128>}, {pipeline_mode = #tpu.pipeline_mode<synchronous>, transform_indices = @transform_4, window_bounds = array<i64: 1, 128>}, {transform_indices = @transform_5, window_bounds = array<i64: 1, 16, 128>}, {transform_indices = @transform_6, window_bounds = array<i64: 1, 1, 128>}, {transform_indices = @transform_7, window_bounds = array<i64: 1, 1, 128>}]} {
    %c0 = arith.constant 0 : index
    %c0_0 = arith.constant 0 : index
    %c0_1 = arith.constant 0 : index
    %0 = vector.load %arg1[%c0, %c0_0, %c0_1] : memref<1x16x128xf32, #tpu.memory_space<vmem>>, vector<1x16x128xf32>
    %1 = vector.shape_cast %0 : vector<1x16x128xf32> to vector<16x128xf32>
    %cst = arith.constant 0.000000e+00 : f32
    %2 = vector.broadcast %cst : f32 to vector<1x128xf32>
    %3 = tpu.concatenate %2, %1, %2 in 0 : vector<1x128xf32>, vector<16x128xf32>, vector<1x128xf32> -> vector<18x128xf32>
    %4 = vector.extract_strided_slice %3 {offsets = [0, 0], sizes = [16, 128], strides = [1, 1]} : vector<18x128xf32> to vector<16x128xf32>
    %5 = arith.truncf %4 : vector<16x128xf32> to vector<16x128xbf16>
    %c0_2 = arith.constant 0 : index
    %c0_3 = arith.constant 0 : index
    %c0_4 = arith.constant 0 : index
    %6 = vector.load %arg2[%c0_2, %c0_3, %c0_4] : memref<3x128x128xbf16, #tpu.memory_space<vmem>>, vector<1x128x128xbf16>
    %7 = vector.shape_cast %6 : vector<1x128x128xbf16> to vector<128x128xbf16>
    %cst_5 = arith.constant dense<0.000000e+00> : vector<16x128xf32>
    %8 = tpu.matmul %5, %7, %cst_5 {dimension_numbers = #tpu.dot_dimension_numbers<[1], [0], [0], [1], [0, 0, 1, 1], [], []>} : vector<16x128xbf16>, vector<128x128xbf16>, vector<16x128xf32> -> vector<16x128xf32>
    %9 = vector.extract_strided_slice %3 {offsets = [1, 0], sizes = [16, 128], strides = [1, 1]} : vector<18x128xf32> to vector<16x128xf32>
    %10 = arith.truncf %9 : vector<16x128xf32> to vector<16x128xbf16>
    %c1 = arith.constant 1 : index
    %c0_6 = arith.constant 0 : index
    %c0_7 = arith.constant 0 : index
    %11 = vector.load %arg2[%c1, %c0_6, %c0_7] : memref<3x128x128xbf16, #tpu.memory_space<vmem>>, vector<1x128x128xbf16>
    %12 = vector.shape_cast %11 : vector<1x128x128xbf16> to vector<128x128xbf16>
    %cst_8 = arith.constant dense<0.000000e+00> : vector<16x128xf32>
    %13 = tpu.matmul %10, %12, %cst_8 {dimension_numbers = #tpu.dot_dimension_numbers<[1], [0], [0], [1], [0, 0, 1, 1], [], []>} : vector<16x128xbf16>, vector<128x128xbf16>, vector<16x128xf32> -> vector<16x128xf32>
    %14 = arith.addf %8, %13 : vector<16x128xf32>
    %15 = vector.extract_strided_slice %3 {offsets = [2, 0], sizes = [16, 128], strides = [1, 1]} : vector<18x128xf32> to vector<16x128xf32>
    %16 = arith.truncf %15 : vector<16x128xf32> to vector<16x128xbf16>
    %c2 = arith.constant 2 : index
    %c0_9 = arith.constant 0 : index
    %c0_10 = arith.constant 0 : index
    %17 = vector.load %arg2[%c2, %c0_9, %c0_10] : memref<3x128x128xbf16, #tpu.memory_space<vmem>>, vector<1x128x128xbf16>
    %18 = vector.shape_cast %17 : vector<1x128x128xbf16> to vector<128x128xbf16>
    %cst_11 = arith.constant dense<0.000000e+00> : vector<16x128xf32>
    %19 = tpu.matmul %16, %18, %cst_11 {dimension_numbers = #tpu.dot_dimension_numbers<[1], [0], [0], [1], [0, 0, 1, 1], [], []>} : vector<16x128xbf16>, vector<128x128xbf16>, vector<16x128xf32> -> vector<16x128xf32>
    %20 = arith.addf %14, %19 : vector<16x128xf32>
    %c0_12 = arith.constant 0 : index
    %c0_13 = arith.constant 0 : index
    %21 = vector.load %arg3[%c0_12, %c0_13] : memref<1x128xf32, #tpu.memory_space<vmem>>, vector<1x128xf32>
    %22 = vector.broadcast %21 : vector<1x128xf32> to vector<16x128xf32>
    %23 = arith.addf %20, %22 : vector<16x128xf32>
    %c0_14 = arith.constant 0 : index
    %c0_15 = arith.constant 0 : index
    %c0_16 = arith.constant 0 : index
    %24 = vector.load %arg6[%c0_14, %c0_15, %c0_16] : memref<1x16x128xf32, #tpu.memory_space<vmem>>, vector<1x16x128xf32>
    %25 = vector.shape_cast %24 : vector<1x16x128xf32> to vector<16x128xf32>
    %26 = vector.shape_cast %23 : vector<16x128xf32> to vector<1x16x128xf32>
    tpu.vector_store %arg6[%c0_14, %c0_15, %c0_16], %26 {strides = array<i32>} : memref<1x16x128xf32, #tpu.memory_space<vmem>>, vector<1x16x128xf32>,
    %cst_17 = arith.constant dense<0.000000e+00> : vector<128xf32>
    %27 = vector.multi_reduction <add>, %23, %cst_17 [0] : vector<16x128xf32> to vector<128xf32>
    %28 = vector.shape_cast %27 : vector<128xf32> to vector<1x128xf32>
    %c0_18 = arith.constant 0 : index
    %c0_19 = arith.constant 0 : index
    %c0_20 = arith.constant 0 : index
    %29 = vector.load %arg7[%c0_18, %c0_19, %c0_20] : memref<1x1x128xf32, #tpu.memory_space<vmem>>, vector<1x1x128xf32>
    %30 = vector.shape_cast %29 : vector<1x1x128xf32> to vector<1x128xf32>
    %31 = vector.shape_cast %28 : vector<1x128xf32> to vector<1x1x128xf32>
    tpu.vector_store %arg7[%c0_18, %c0_19, %c0_20], %31 {strides = array<i32>} : memref<1x1x128xf32, #tpu.memory_space<vmem>>, vector<1x1x128xf32>,
    %32 = arith.mulf %23, %23 : vector<16x128xf32>
    %cst_21 = arith.constant dense<0.000000e+00> : vector<128xf32>
    %33 = vector.multi_reduction <add>, %32, %cst_21 [0] : vector<16x128xf32> to vector<128xf32>
    %34 = vector.shape_cast %33 : vector<128xf32> to vector<1x128xf32>
    %c0_22 = arith.constant 0 : index
    %c0_23 = arith.constant 0 : index
    %c0_24 = arith.constant 0 : index
    %35 = vector.load %arg8[%c0_22, %c0_23, %c0_24] : memref<1x1x128xf32, #tpu.memory_space<vmem>>, vector<1x1x128xf32>
    %36 = vector.shape_cast %35 : vector<1x1x128xf32> to vector<1x128xf32>
    %37 = vector.shape_cast %34 : vector<1x128xf32> to vector<1x1x128xf32>
    tpu.vector_store %arg8[%c0_22, %c0_23, %c0_24], %37 {strides = array<i32>} : memref<1x1x128xf32, #tpu.memory_space<vmem>>, vector<1x1x128xf32>,
    return
  }
  func.func @transform_0(%arg0: i32) -> (i32, i32, i32) {
    %c0_i32 = arith.constant 0 : i32
    %c0_i32_0 = arith.constant 0 : i32
    %c0_i32_1 = arith.constant 0 : i32
    return %arg0, %c0_i32, %c0_i32_0 : i32, i32, i32
  }
  func.func @transform_1(%arg0: i32) -> (i32, i32, i32) {
    %c0_i32 = arith.constant 0 : i32
    %c0_i32_0 = arith.constant 0 : i32
    %c0_i32_1 = arith.constant 0 : i32
    %c0_i32_2 = arith.constant 0 : i32
    return %c0_i32, %c0_i32_0, %c0_i32_1 : i32, i32, i32
  }
  func.func @transform_2(%arg0: i32) -> (i32, i32) {
    %c0_i32 = arith.constant 0 : i32
    %c0_i32_0 = arith.constant 0 : i32
    %c0_i32_1 = arith.constant 0 : i32
    return %c0_i32, %c0_i32_0 : i32, i32
  }
  func.func @transform_3(%arg0: i32) -> (i32, i32) {
    %c0_i32 = arith.constant 0 : i32
    %c0_i32_0 = arith.constant 0 : i32
    %c0_i32_1 = arith.constant 0 : i32
    return %c0_i32, %c0_i32_0 : i32, i32
  }
  func.func @transform_4(%arg0: i32) -> (i32, i32) {
    %c0_i32 = arith.constant 0 : i32
    %c0_i32_0 = arith.constant 0 : i32
    %c0_i32_1 = arith.constant 0 : i32
    return %c0_i32, %c0_i32_0 : i32, i32
  }
  func.func @transform_5(%arg0: i32) -> (i32, i32, i32) {
    %c0_i32 = arith.constant 0 : i32
    %c0_i32_0 = arith.constant 0 : i32
    %c0_i32_1 = arith.constant 0 : i32
    return %arg0, %c0_i32, %c0_i32_0 : i32, i32, i32
  }
  func.func @transform_6(%arg0: i32) -> (i32, i32, i32) {
    %c0_i32 = arith.constant 0 : i32
    %c0_i32_0 = arith.constant 0 : i32
    %c0_i32_1 = arith.constant 0 : i32
    return %arg0, %c0_i32, %c0_i32_0 : i32, i32, i32
  }
  func.func @transform_7(%arg0: i32) -> (i32, i32, i32) {
    %c0_i32 = arith.constant 0 : i32
    %c0_i32_0 = arith.constant 0 : i32
    %c0_i32_1 = arith.constant 0 : i32
    return %arg0, %c0_i32, %c0_i32_0 : i32, i32, i32
  }
}

module attributes {stable_mosaic.version = 11 : i64} {
  func.func @conv_stage_kernel(%arg0: i32, %arg1: memref<1x16x128xf32, #tpu.memory_space<vmem>>, %arg2: memref<3x128x128xbf16, #tpu.memory_space<vmem>>, %arg3: memref<1x128xf32, #tpu.memory_space<vmem>>, %arg4: memref<1x128xf32, #tpu.memory_space<vmem>>, %arg5: memref<1x128xf32, #tpu.memory_space<vmem>>, %arg6: memref<1x16x128xf32, #tpu.memory_space<vmem>>, %arg7: memref<1x1x128xf32, #tpu.memory_space<vmem>>, %arg8: memref<1x1x128xf32, #tpu.memory_space<vmem>>) attributes {dimension_semantics = [#tpu.dimension_semantics<parallel>], iteration_bounds = array<i64: 2>, scalar_prefetch = 0 : i64, scratch_operands = 0 : i64, tpu.core_type = #tpu.core_type<tc>, window_params = [{transform_indices = @transform_0, window_bounds = array<i64: 1, 16, 128>}, {pipeline_mode = #tpu.pipeline_mode<synchronous>, transform_indices = @transform_1, window_bounds = array<i64: 3, 128, 128>}, {pipeline_mode = #tpu.pipeline_mode<synchronous>, transform_indices = @transform_2, window_bounds = array<i64: 1, 128>}, {pipeline_mode = #tpu.pipeline_mode<synchronous>, transform_indices = @transform_3, window_bounds = array<i64: 1, 128>}, {pipeline_mode = #tpu.pipeline_mode<synchronous>, transform_indices = @transform_4, window_bounds = array<i64: 1, 128>}, {transform_indices = @transform_5, window_bounds = array<i64: 1, 16, 128>}, {transform_indices = @transform_6, window_bounds = array<i64: 1, 1, 128>}, {transform_indices = @transform_7, window_bounds = array<i64: 1, 1, 128>}]} {
    %c0 = arith.constant 0 : index
    %c0_0 = arith.constant 0 : index
    %c0_1 = arith.constant 0 : index
    %0 = vector.load %arg1[%c0, %c0_0, %c0_1] : memref<1x16x128xf32, #tpu.memory_space<vmem>>, vector<1x16x128xf32>
    %1 = vector.shape_cast %0 : vector<1x16x128xf32> to vector<16x128xf32>
    %c0_2 = arith.constant 0 : index
    %c0_3 = arith.constant 0 : index
    %2 = vector.load %arg4[%c0_2, %c0_3] : memref<1x128xf32, #tpu.memory_space<vmem>>, vector<1x128xf32>
    %3 = vector.broadcast %2 : vector<1x128xf32> to vector<16x128xf32>
    %4 = arith.mulf %1, %3 : vector<16x128xf32>
    %c0_4 = arith.constant 0 : index
    %c0_5 = arith.constant 0 : index
    %5 = vector.load %arg5[%c0_4, %c0_5] : memref<1x128xf32, #tpu.memory_space<vmem>>, vector<1x128xf32>
    %6 = vector.broadcast %5 : vector<1x128xf32> to vector<16x128xf32>
    %7 = arith.addf %4, %6 : vector<16x128xf32>
    %cst = arith.constant 0.000000e+00 : f32
    %8 = vector.broadcast %cst : f32 to vector<16x128xf32>
    %9 = arith.maximumf %7, %8 : vector<16x128xf32>
    %cst_6 = arith.constant 0.000000e+00 : f32
    %10 = vector.broadcast %cst_6 : f32 to vector<1x128xf32>
    %11 = tpu.concatenate %10, %9, %10 in 0 : vector<1x128xf32>, vector<16x128xf32>, vector<1x128xf32> -> vector<18x128xf32>
    %12 = vector.extract_strided_slice %11 {offsets = [0, 0], sizes = [16, 128], strides = [1, 1]} : vector<18x128xf32> to vector<16x128xf32>
    %13 = arith.truncf %12 : vector<16x128xf32> to vector<16x128xbf16>
    %c0_7 = arith.constant 0 : index
    %c0_8 = arith.constant 0 : index
    %c0_9 = arith.constant 0 : index
    %14 = vector.load %arg2[%c0_7, %c0_8, %c0_9] : memref<3x128x128xbf16, #tpu.memory_space<vmem>>, vector<1x128x128xbf16>
    %15 = vector.shape_cast %14 : vector<1x128x128xbf16> to vector<128x128xbf16>
    %cst_10 = arith.constant dense<0.000000e+00> : vector<16x128xf32>
    %16 = tpu.matmul %13, %15, %cst_10 {dimension_numbers = #tpu.dot_dimension_numbers<[1], [0], [0], [1], [0, 0, 1, 1], [], []>} : vector<16x128xbf16>, vector<128x128xbf16>, vector<16x128xf32> -> vector<16x128xf32>
    %17 = vector.extract_strided_slice %11 {offsets = [1, 0], sizes = [16, 128], strides = [1, 1]} : vector<18x128xf32> to vector<16x128xf32>
    %18 = arith.truncf %17 : vector<16x128xf32> to vector<16x128xbf16>
    %c1 = arith.constant 1 : index
    %c0_11 = arith.constant 0 : index
    %c0_12 = arith.constant 0 : index
    %19 = vector.load %arg2[%c1, %c0_11, %c0_12] : memref<3x128x128xbf16, #tpu.memory_space<vmem>>, vector<1x128x128xbf16>
    %20 = vector.shape_cast %19 : vector<1x128x128xbf16> to vector<128x128xbf16>
    %cst_13 = arith.constant dense<0.000000e+00> : vector<16x128xf32>
    %21 = tpu.matmul %18, %20, %cst_13 {dimension_numbers = #tpu.dot_dimension_numbers<[1], [0], [0], [1], [0, 0, 1, 1], [], []>} : vector<16x128xbf16>, vector<128x128xbf16>, vector<16x128xf32> -> vector<16x128xf32>
    %22 = arith.addf %16, %21 : vector<16x128xf32>
    %23 = vector.extract_strided_slice %11 {offsets = [2, 0], sizes = [16, 128], strides = [1, 1]} : vector<18x128xf32> to vector<16x128xf32>
    %24 = arith.truncf %23 : vector<16x128xf32> to vector<16x128xbf16>
    %c2 = arith.constant 2 : index
    %c0_14 = arith.constant 0 : index
    %c0_15 = arith.constant 0 : index
    %25 = vector.load %arg2[%c2, %c0_14, %c0_15] : memref<3x128x128xbf16, #tpu.memory_space<vmem>>, vector<1x128x128xbf16>
    %26 = vector.shape_cast %25 : vector<1x128x128xbf16> to vector<128x128xbf16>
    %cst_16 = arith.constant dense<0.000000e+00> : vector<16x128xf32>
    %27 = tpu.matmul %24, %26, %cst_16 {dimension_numbers = #tpu.dot_dimension_numbers<[1], [0], [0], [1], [0, 0, 1, 1], [], []>} : vector<16x128xbf16>, vector<128x128xbf16>, vector<16x128xf32> -> vector<16x128xf32>
    %28 = arith.addf %22, %27 : vector<16x128xf32>
    %c0_17 = arith.constant 0 : index
    %c0_18 = arith.constant 0 : index
    %29 = vector.load %arg3[%c0_17, %c0_18] : memref<1x128xf32, #tpu.memory_space<vmem>>, vector<1x128xf32>
    %30 = vector.broadcast %29 : vector<1x128xf32> to vector<16x128xf32>
    %31 = arith.addf %28, %30 : vector<16x128xf32>
    %c0_19 = arith.constant 0 : index
    %c0_20 = arith.constant 0 : index
    %c0_21 = arith.constant 0 : index
    %32 = vector.load %arg6[%c0_19, %c0_20, %c0_21] : memref<1x16x128xf32, #tpu.memory_space<vmem>>, vector<1x16x128xf32>
    %33 = vector.shape_cast %32 : vector<1x16x128xf32> to vector<16x128xf32>
    %34 = vector.shape_cast %31 : vector<16x128xf32> to vector<1x16x128xf32>
    tpu.vector_store %arg6[%c0_19, %c0_20, %c0_21], %34 {strides = array<i32>} : memref<1x16x128xf32, #tpu.memory_space<vmem>>, vector<1x16x128xf32>,
    %cst_22 = arith.constant dense<0.000000e+00> : vector<128xf32>
    %35 = vector.multi_reduction <add>, %31, %cst_22 [0] : vector<16x128xf32> to vector<128xf32>
    %36 = vector.shape_cast %35 : vector<128xf32> to vector<1x128xf32>
    %c0_23 = arith.constant 0 : index
    %c0_24 = arith.constant 0 : index
    %c0_25 = arith.constant 0 : index
    %37 = vector.load %arg7[%c0_23, %c0_24, %c0_25] : memref<1x1x128xf32, #tpu.memory_space<vmem>>, vector<1x1x128xf32>
    %38 = vector.shape_cast %37 : vector<1x1x128xf32> to vector<1x128xf32>
    %39 = vector.shape_cast %36 : vector<1x128xf32> to vector<1x1x128xf32>
    tpu.vector_store %arg7[%c0_23, %c0_24, %c0_25], %39 {strides = array<i32>} : memref<1x1x128xf32, #tpu.memory_space<vmem>>, vector<1x1x128xf32>,
    %40 = arith.mulf %31, %31 : vector<16x128xf32>
    %cst_26 = arith.constant dense<0.000000e+00> : vector<128xf32>
    %41 = vector.multi_reduction <add>, %40, %cst_26 [0] : vector<16x128xf32> to vector<128xf32>
    %42 = vector.shape_cast %41 : vector<128xf32> to vector<1x128xf32>
    %c0_27 = arith.constant 0 : index
    %c0_28 = arith.constant 0 : index
    %c0_29 = arith.constant 0 : index
    %43 = vector.load %arg8[%c0_27, %c0_28, %c0_29] : memref<1x1x128xf32, #tpu.memory_space<vmem>>, vector<1x1x128xf32>
    %44 = vector.shape_cast %43 : vector<1x1x128xf32> to vector<1x128xf32>
    %45 = vector.shape_cast %42 : vector<1x128xf32> to vector<1x1x128xf32>
    tpu.vector_store %arg8[%c0_27, %c0_28, %c0_29], %45 {strides = array<i32>} : memref<1x1x128xf32, #tpu.memory_space<vmem>>, vector<1x1x128xf32>,
    return
  }
  func.func @transform_0(%arg0: i32) -> (i32, i32, i32) {
    %c0_i32 = arith.constant 0 : i32
    %c0_i32_0 = arith.constant 0 : i32
    %c0_i32_1 = arith.constant 0 : i32
    return %arg0, %c0_i32, %c0_i32_0 : i32, i32, i32
  }
  func.func @transform_1(%arg0: i32) -> (i32, i32, i32) {
    %c0_i32 = arith.constant 0 : i32
    %c0_i32_0 = arith.constant 0 : i32
    %c0_i32_1 = arith.constant 0 : i32
    %c0_i32_2 = arith.constant 0 : i32
    return %c0_i32, %c0_i32_0, %c0_i32_1 : i32, i32, i32
  }
  func.func @transform_2(%arg0: i32) -> (i32, i32) {
    %c0_i32 = arith.constant 0 : i32
    %c0_i32_0 = arith.constant 0 : i32
    %c0_i32_1 = arith.constant 0 : i32
    return %c0_i32, %c0_i32_0 : i32, i32
  }
  func.func @transform_3(%arg0: i32) -> (i32, i32) {
    %c0_i32 = arith.constant 0 : i32
    %c0_i32_0 = arith.constant 0 : i32
    %c0_i32_1 = arith.constant 0 : i32
    return %c0_i32, %c0_i32_0 : i32, i32
  }
  func.func @transform_4(%arg0: i32) -> (i32, i32) {
    %c0_i32 = arith.constant 0 : i32
    %c0_i32_0 = arith.constant 0 : i32
    %c0_i32_1 = arith.constant 0 : i32
    return %c0_i32, %c0_i32_0 : i32, i32
  }
  func.func @transform_5(%arg0: i32) -> (i32, i32, i32) {
    %c0_i32 = arith.constant 0 : i32
    %c0_i32_0 = arith.constant 0 : i32
    %c0_i32_1 = arith.constant 0 : i32
    return %arg0, %c0_i32, %c0_i32_0 : i32, i32, i32
  }
  func.func @transform_6(%arg0: i32) -> (i32, i32, i32) {
    %c0_i32 = arith.constant 0 : i32
    %c0_i32_0 = arith.constant 0 : i32
    %c0_i32_1 = arith.constant 0 : i32
    return %arg0, %c0_i32, %c0_i32_0 : i32, i32, i32
  }
  func.func @transform_7(%arg0: i32) -> (i32, i32, i32) {
    %c0_i32 = arith.constant 0 : i32
    %c0_i32_0 = arith.constant 0 : i32
    %c0_i32_1 = arith.constant 0 : i32
    return %arg0, %c0_i32, %c0_i32_0 : i32, i32, i32
  }
}

module attributes {stable_mosaic.version = 11 : i64} {
  func.func @bn_relu_kernel(%arg0: i32, %arg1: memref<1x16x128xf32, #tpu.memory_space<vmem>>, %arg2: memref<1x1x128xf32, #tpu.memory_space<vmem>>, %arg3: memref<1x1x128xf32, #tpu.memory_space<vmem>>, %arg4: memref<1x16x128xf32, #tpu.memory_space<vmem>>) attributes {dimension_semantics = [#tpu.dimension_semantics<parallel>], iteration_bounds = array<i64: 2>, scalar_prefetch = 0 : i64, scratch_operands = 0 : i64, tpu.core_type = #tpu.core_type<tc>, window_params = [{transform_indices = @transform_0, window_bounds = array<i64: 1, 16, 128>}, {pipeline_mode = #tpu.pipeline_mode<synchronous>, transform_indices = @transform_1, window_bounds = array<i64: 1, 1, 128>}, {pipeline_mode = #tpu.pipeline_mode<synchronous>, transform_indices = @transform_2, window_bounds = array<i64: 1, 1, 128>}, {transform_indices = @transform_3, window_bounds = array<i64: 1, 16, 128>}]} {
    %c0 = arith.constant 0 : index
    %c0_0 = arith.constant 0 : index
    %c0_1 = arith.constant 0 : index
    %0 = vector.load %arg1[%c0, %c0_0, %c0_1] : memref<1x16x128xf32, #tpu.memory_space<vmem>>, vector<1x16x128xf32>
    %c0_2 = arith.constant 0 : index
    %c0_3 = arith.constant 0 : index
    %c0_4 = arith.constant 0 : index
    %1 = vector.load %arg2[%c0_2, %c0_3, %c0_4] : memref<1x1x128xf32, #tpu.memory_space<vmem>>, vector<1x1x128xf32>
    %2 = vector.broadcast %1 : vector<1x1x128xf32> to vector<1x16x128xf32>
    %3 = arith.mulf %0, %2 : vector<1x16x128xf32>
    %c0_5 = arith.constant 0 : index
    %c0_6 = arith.constant 0 : index
    %c0_7 = arith.constant 0 : index
    %4 = vector.load %arg3[%c0_5, %c0_6, %c0_7] : memref<1x1x128xf32, #tpu.memory_space<vmem>>, vector<1x1x128xf32>
    %5 = vector.broadcast %4 : vector<1x1x128xf32> to vector<1x16x128xf32>
    %6 = arith.addf %3, %5 : vector<1x16x128xf32>
    %cst = arith.constant 0.000000e+00 : f32
    %7 = vector.broadcast %cst : f32 to vector<1x16x128xf32>
    %8 = arith.maximumf %6, %7 : vector<1x16x128xf32>
    %c0_8 = arith.constant 0 : index
    %c0_9 = arith.constant 0 : index
    %c0_10 = arith.constant 0 : index
    %9 = vector.load %arg4[%c0_8, %c0_9, %c0_10] : memref<1x16x128xf32, #tpu.memory_space<vmem>>, vector<1x16x128xf32>
    tpu.vector_store %arg4[%c0_8, %c0_9, %c0_10], %8 {strides = array<i32>} : memref<1x16x128xf32, #tpu.memory_space<vmem>>, vector<1x16x128xf32>,
    return
  }
  func.func @transform_0(%arg0: i32) -> (i32, i32, i32) {
    %c0_i32 = arith.constant 0 : i32
    %c0_i32_0 = arith.constant 0 : i32
    %c0_i32_1 = arith.constant 0 : i32
    return %arg0, %c0_i32, %c0_i32_0 : i32, i32, i32
  }
  func.func @transform_1(%arg0: i32) -> (i32, i32, i32) {
    %c0_i32 = arith.constant 0 : i32
    %c0_i32_0 = arith.constant 0 : i32
    %c0_i32_1 = arith.constant 0 : i32
    %c0_i32_2 = arith.constant 0 : i32
    return %c0_i32, %c0_i32_0, %c0_i32_1 : i32, i32, i32
  }
  func.func @transform_2(%arg0: i32) -> (i32, i32, i32) {
    %c0_i32 = arith.constant 0 : i32
    %c0_i32_0 = arith.constant 0 : i32
    %c0_i32_1 = arith.constant 0 : i32
    %c0_i32_2 = arith.constant 0 : i32
    return %c0_i32, %c0_i32_0, %c0_i32_1 : i32, i32, i32
  }
  func.func @transform_3(%arg0: i32) -> (i32, i32, i32) {
    %c0_i32 = arith.constant 0 : i32
    %c0_i32_0 = arith.constant 0 : i32
    %c0_i32_1 = arith.constant 0 : i32
    return %arg0, %c0_i32, %c0_i32_0 : i32, i32, i32
  }
}

</mosaic_0001>

<bundles_post_ra>
// kernel: tile.37
= control target key start
LH: loop header
LB: loop body
LE: loop exit
PB: predicated region body
PF: predicated region fallthrough
CT: control target
= control target key end

     0   :  { %s28_s0 = inlined_call_operand.vmem [shape: f32[8], index: 0, kind: input, shape index: {}]   ;;  %s29_s1 = inlined_call_operand.vmem [shape: f32[16,8], index: 1, kind: output, shape index: {}]  }
   0x1   :  { %v4_v0 = vld [vmem:[%s28_s0] ss:$0 sm:$0xff] }
   0x2   :  { %5 = vst [vmem:[%s29_s1] sm:$0xff] %v4_v0  ;;  %8 = vst [vmem:[%s29_s1 + $0x8] sm:$0xff] %v4_v0 }

// kernel: tile.38
= control target key start
LH: loop header
LB: loop body
LE: loop exit
PB: predicated region body
PF: predicated region fallthrough
CT: control target
= control target key end

     0   :  { %s133_s10 = smov 120   ;;  %s134_s11 = smov 104   ;;  %vm3_vm0 = vcmask 64512   ;;  %vm9_vm1 = vcmask 1048512   ;;  %vm15_vm2 = vcmask 982912   ;;  %vm21_vm3 = vcmask 917312   ;;  %s209_s0 = inlined_call_operand.vmem [shape: f32[16,8], index: 0, kind: input, shape index: {}]   ;;  %s210_s1 = inlined_call_operand.vmem [shape: f32[1,128], index: 1, kind: output, shape index: {}]  }
   0x1   :  { %v103_v0 = vld [vmem:[%s209_s0 + $0xf] sm:$0x1]   ;;  %v105_v1 = vld [vmem:[%s209_s0 + $0xd] sm:$0x1]   ;;  %v104_v2 = vld [vmem:[%s209_s0 + $0xe] sm:$0x1]  }
   0x2   :  { %7 = vrot.lane.b32.xlu0 %v103_v0, %s133_s10  ;;  %19 = vrot.lane.b32.xlu1 %v105_v1, %s134_s11  ;;  %v106_v3 = vld [vmem:[%s209_s0 + $0xc] sm:$0x1]   ;;  %s135_s16 = smov 112   ;;  %s136_s17 = smov 96   ;;  %v107_v4 = vld [vmem:[%s209_s0 + $0xb] sm:$0x1]  }
   0x3   :  { %v108_v5 = vld [vmem:[%s209_s0 + $0xa] sm:$0x1]   ;;  %v2_v6 = vld [vmem:[%s209_s0] sm:$0x1]   ;;  %s137_s24 = smov 88   ;;  %s138_s25 = smov 80  }
   0x4   :  { %4 = vst.msk [vmem:[#allocation0] sm:$0x1] %vm3_vm0, %v2_v6   ;;  %v109_v7 = vld [vmem:[%s209_s0 + $0x9] sm:$0x1]   ;;  %v110_v8 = vld [vmem:[%s209_s0 + $0x8] sm:$0x1]  }
   0x5   :  { %s139_s30 = smov 72   ;;  %s140_s2 = smov 64   ;;  %v111_v9 = vld [vmem:[%s209_s0 + $0x7] sm:$0x1]   ;;  %v112_v10 = vld [vmem:[%s209_s0 + $0x6] sm:$0x1]  }
   0x6   :  { %13 = vrot.lane.b32.xlu0 %v104_v2, %s135_s16  ;;  %25 = vrot.lane.b32.xlu1 %v106_v3, %s136_s17  ;;  %s141_s7 = smov 56   ;;  %s142_s8 = smov 48   ;;  %v113_v11 = vld [vmem:[%s209_s0 + $0x5] sm:$0x1]   ;;  %v114_v12 = vld [vmem:[%s209_s0 + $0x4] sm:$0x1]  }
   0x7   :  { %s143_s13 = smov 40   ;;  %s144_s14 = smov 32   ;;  %v115_v13 = vld [vmem:[%s209_s0 + $0x3] sm:$0x1]   ;;  %v116_v14 = vld [vmem:[%s209_s0 + $0x2] sm:$0x1]  }
   0x8   :  { %s145_s19 = smov 24   ;;  %s146_s20 = smov 16   ;;  %v117_v15 = vld [vmem:[%s209_s0 + $0x1] sm:$0x1]   ;;  %vm27_vm4 = vcmask 851712   ;;  %vm33_vm5 = vcmask 786112  }
   0x9   :  { %s147_s0 = smov 8   ;;  %vm39_vm6 = vcmask 720512   ;;  %vm45_vm7 = vcmask 654912   ;;  %vm51_vm8 = vcmask 589312   ;;  %vm57_vm9 = vcmask 523712  }
   0xa   :  { %31 = vrot.lane.b32.xlu0 %v107_v4, %s137_s24  ;;  %37 = vrot.lane.b32.xlu1 %v108_v5, %s138_s25  ;;  %vm63_vm10 = vcmask 458112   ;;  %vm69_vm11 = vcmask 392512   ;;  %vm75_vm12 = vcmask 326912   ;;  %vm81_vm13 = vcmask 261312  }
   0xb   :  { %vm87_vm14 = vcmask 195712   ;;  %vm93_vm15 = vcmask 130112  }
   0xe   :  { %43 = vrot.lane.b32.xlu0 %v109_v7, %s139_s30  ;;  %49 = vrot.lane.b32.xlu1 %v110_v8, %s140_s2 }
  0x12   :  { %55 = vrot.lane.b32.xlu0 %v111_v9, %s141_s7  ;;  %61 = vrot.lane.b32.xlu1 %v112_v10, %s142_s8 }
  0x16   :  { %67 = vrot.lane.b32.xlu0 %v113_v11, %s143_s13  ;;  %73 = vrot.lane.b32.xlu1 %v114_v12, %s144_s14 }
  0x1a   :  { %79 = vrot.lane.b32.xlu0 %v115_v13, %s145_s19  ;;  %85 = vrot.lane.b32.xlu1 %v116_v14, %s146_s20 }
  0x1e   :  { %91 = vrot.lane.b32.xlu0 %v117_v15, %s147_s0 }
  0x74   :  { %v8_v16 = vpop.permute.xlu0 %7   ;;  %v20_v17 = vpop.permute.xlu1 %19  }
  0x75   :  { %10 = vst.msk [vmem:[#allocation0] sm:$0x1] %vm9_vm1, %v8_v16  }
  0x78   :  { %v14_v18 = vpop.permute.xlu0 %13   ;;  %v26_v19 = vpop.permute.xlu1 %25  }
  0x79   :  { %16 = vst.msk [vmem:[#allocation0] sm:$0x1] %vm15_vm2, %v14_v18  }
  0x7a   :  { %22 = vst.msk [vmem:[#allocation0] sm:$0x1] %vm21_vm3, %v20_v17  }
  0x7b   :  { %28 = vst.msk [vmem:[#allocation0] sm:$0x1] %vm27_vm4, %v26_v19  }
  0x7c   :  { %v32_v20 = vpop.permute.xlu0 %31   ;;  %v38_v21 = vpop.permute.xlu1 %37  }
  0x7d   :  { %34 = vst.msk [vmem:[#allocation0] sm:$0x1] %vm33_vm5, %v32_v20  }
  0x7e   :  { %40 = vst.msk [vmem:[#allocation0] sm:$0x1] %vm39_vm6, %v38_v21  }
  0x80   :  { %v44_v22 = vpop.permute.xlu0 %43   ;;  %v50_v23 = vpop.permute.xlu1 %49  }
  0x81   :  { %46 = vst.msk [vmem:[#allocation0] sm:$0x1] %vm45_vm7, %v44_v22  }
  0x82   :  { %52 = vst.msk [vmem:[#allocation0] sm:$0x1] %vm51_vm8, %v50_v23  }
  0x84   :  { %v56_v24 = vpop.permute.xlu0 %55   ;;  %v62_v25 = vpop.permute.xlu1 %61  }
  0x85   :  { %58 = vst.msk [vmem:[#allocation0] sm:$0x1] %vm57_vm9, %v56_v24  }
  0x86   :  { %64 = vst.msk [vmem:[#allocation0] sm:$0x1] %vm63_vm10, %v62_v25  }
  0x88   :  { %v68_v26 = vpop.permute.xlu0 %67   ;;  %v74_v27 = vpop.permute.xlu1 %73  }
  0x89   :  { %70 = vst.msk [vmem:[#allocation0] sm:$0x1] %vm69_vm11, %v68_v26  }
  0x8a   :  { %76 = vst.msk [vmem:[#allocation0] sm:$0x1] %vm75_vm12, %v74_v27  }
  0x8c   :  { %v80_v28 = vpop.permute.xlu0 %79   ;;  %v86_v29 = vpop.permute.xlu1 %85  }
  0x8d   :  { %82 = vst.msk [vmem:[#allocation0] sm:$0x1] %vm81_vm13, %v80_v28  }
  0x8e   :  { %88 = vst.msk [vmem:[#allocation0] sm:$0x1] %vm87_vm14, %v86_v29  }
  0x90   :  { %v92_v30 = vpop.permute.xlu0 %91  }
  0x91   :  { %94 = vst.msk [vmem:[#allocation0] sm:$0x1] %vm93_vm15, %v92_v30  }
  0x98   :  { %v99_v31 = vld [vmem:[#allocation0] sm:$0x1] }
  0x99   :  { %102 = vst [vmem:[%s210_s1] sm:$0x1] %v99_v31 }

// kernel: tile.32
= control target key start
LH: loop header
LB: loop body
LE: loop exit
PB: predicated region body
PF: predicated region fallthrough
CT: control target
= control target key end

     0   :  { %s20_s0 = inlined_call_operand.<no memory space> [shape: f32[], index: 0, kind: input, shape index: {}]   ;;  %s21_s1 = inlined_call_operand.vmem [shape: f32[1,128], index: 1, kind: output, shape index: {}]  }
   0x1   :  { %v2_v0 = vstv %s20_s0 }
   0x2   :  { %3 = vst [vmem:[%s21_s1] sm:$0x1] %v2_v0 }

// kernel: up_forward.3
= control target key start
LH: loop header
LB: loop body
LE: loop exit
PB: predicated region body
PF: predicated region fallthrough
CT: control target
= control target key end

     0   :  { %s1033_s24 = smov 0   ;;  %s1174_s0 = inlined_call_operand.vmem [shape: f32[2,16,128], index: 0, kind: input, shape index: {}]   ;;  %s1175_s1 = inlined_call_operand.vmem [shape: bf16[3,128,128], index: 1, kind: input, shape index: {}]   ;;  %s1176_s2 = inlined_call_operand.vmem [shape: f32[1,128], index: 2, kind: input, shape index: {}]   ;;  %s1177_s3 = inlined_call_operand.vmem [shape: f32[1,128], index: 3, kind: input, shape index: {}]   ;;  %s1178_s4 = inlined_call_operand.vmem [shape: f32[1,128], index: 4, kind: input, shape index: {}]   ;;  %s1179_s5 = inlined_call_operand.vmem [shape: f32[2,16,128], index: 5, kind: output, shape index: {0}]   ;;  %s1180_s6 = inlined_call_operand.vmem [shape: f32[2,1,128], index: 6, kind: output, shape index: {1}]   ;;  %s1181_s7 = inlined_call_operand.vmem [shape: f32[2,1,128], index: 7, kind: output, shape index: {2}]  }
   0x1 LB: > { %s786_s3 = sadd.s32 4294967295, %s988_s24   ;;  %p790_p0 = scmp.ge.s32.totalorder %s988_s24, 1  ;;  %s988_s24 = sphi %s1033_s24, %s18_s24  }
   0x2   : > { %p242_p1 = scmp.lt.s32.totalorder %s988_s24, 3 }
   0x4   : > { %p243_p2 = pnand %p790_p0, %p242_p1 }
   0x5   : > { %p280_p3 = scmp.lt.s32.totalorder (!%p243_p2), %s786_s3, 1 }
   0x6   : > { %246 = sbr.rel (%p243_p2) target bundleno = 294 (0x126), region = 40 }
   0xb   : > { %v958_v0 = vld [vmem:[%s1175_s1 + $0x78] sm:$0xff]   ;;  %v990_v1 = vmov 0.0   ;;  %v960_v3 = vld [vmem:[%s1175_s1 + $0x70] sm:$0xff]   ;;  %vm991_vm0 = vmmov 0   ;;  %v962_v5 = vld [vmem:[%s1175_s1 + $0x68] sm:$0xff]   ;;  %s1183_s3 = smov (!%p280_p3, %s786_s3), 1 }
   0xc   : > { %887 = vmatprep.subr.bf16.mxu0 %v990_v1  ;;  %907 = vmatprep.subr.bf16.mxu1 %v990_v1  ;;  %v959_v2 = vld [vmem:[%s1175_s1 + $0x38] sm:$0xff]   ;;  %v961_v4 = vld [vmem:[%s1175_s1 + $0x30] sm:$0xff]   ;;  %v963_v6 = vld [vmem:[%s1175_s1 + $0x28] sm:$0xff]   ;;  %s858_s15 = sshll.u32 %s1183_s3, 4  ;;  %vm301_vm1 = vcmask 1040384   ;;  %vm992_vm4 = vmmov 1   ;;  %s292_s14 = scalar_lea.vmem %s1180_s6, %s1183_s3 }
   0xd   : > { %888 = vmatpush3.bf16.msra.mxu0 %v958_v0  ;;  %903 = vmatprep.mubr.msk.bf16.mxu0 %vm991_vm0, %v990_v1  ;;  %v964_v7 = vld [vmem:[%s1175_s1 + $0x60] sm:$0xff]   ;;  %s284_s20 = scalar_lea.vmem %s1174_s0, %s858_s15  ;;  %v966_v9 = vld [vmem:[%s1175_s1 + $0x58] sm:$0xff]   ;;  %v968_v15 = vld [vmem:[%s1175_s1 + $0x50] sm:$0xff]   ;;  %vm345_vm2 = vsmask.f32 7424  ;;  %vm556_vm6 = vcmask 1046528   ;;  %s289_s12 = scalar_lea.vmem %s1179_s5, %s858_s15 }
   0xe   : > { %908 = vmatpush3.bf16.msra.mxu1 %v959_v2  ;;  %889 = vmatprep.subr.bf16.mxu0 %v990_v1  ;;  %v965_v8 = vld [vmem:[%s1175_s1 + $0x20] sm:$0xff]   ;;  %v967_v10 = vld [vmem:[%s1175_s1 + $0x18] sm:$0xff]   ;;  %v298_v12 = vld [vmem:[%s284_s20 + $0x8] sm:$0xff]  ;;  %s295_s18 = scalar_lea.vmem %s1181_s7, %s1183_s3 }
   0xf   : > { %909 = vmatprep.subr.bf16.mxu1 %v990_v1  ;;  %923 = vmatprep.mubr.msk.bf16.mxu1 %vm991_vm0, %v990_v1  ;;  %v297_v11 = vld [vmem:[%s284_s20] sm:$0xff]  ;;  %v303_v14 = vrot.slane %v298_v12, 7  ;;  %v969_v16 = vld [vmem:[%s1175_s1 + $0x10] sm:$0xff]   ;;  %v970_v22 = vld [vmem:[%s1175_s1 + $0x48] sm:$0xff]  }
  0x10   : > { %v302_v13 = vrot.slane %v297_v11, 7  ;;  %v971_v26 = vld [vmem:[%s1175_s1 + $0x8] sm:$0xff]   ;;  %v972_v28 = vld [vmem:[%s1175_s1 + $0x40] sm:$0xff]   ;;  %vm827_vm3 = vmneg %vm301_vm1 }
  0x11   : > { %890 = vmatpush3.bf16.msra.mxu0 %v960_v3  ;;  %v309_v19 = vsel %vm301_vm1, %v303_v14, 0.0  ;;  %v973_v31 = vld [vmem:[%s1175_s1] sm:$0xff]   ;;  %v974_v34 = vld [vmem:[%s1175_s1 + $0xb8] sm:$0xff]   ;;  %vm828_vm5 = vmpackc.low %vm992_vm4, %vm827_vm3 }
  0x12   : > { %910 = vmatpush3.bf16.msra.mxu1 %v961_v4  ;;  %891 = vmatprep.subr.bf16.mxu0 %v990_v1  ;;  %v304_v17 = vsel %vm301_vm1, %v302_v13, %v303_v14  ;;  %v308_v18 = vsel %vm301_vm1, 0.0, %v302_v13  ;;  %v327_v21 = vpack.c.bf16 %v309_v19, %v309_v19  ;;  %v975_v35 = vld [vmem:[%s1175_s1 + $0xb0] sm:$0xff]   ;;  %v976_v36 = vld [vmem:[%s1175_s1 + $0xa8] sm:$0xff]   ;;  %v977_v37 = vld [vmem:[%s1175_s1 + $0xa0] sm:$0xff]  }
  0x13   : > { %911 = vmatprep.subr.bf16.mxu1 %v990_v1  ;;  %v310_v20 = vpack.c.bf16 %v304_v17, %v308_v18  ;;  %v829_v33 = vpack.c.bf16 %v304_v17, %v302_v13  ;;  %v978_v38 = vld [vmem:[%s1175_s1 + $0x98] sm:$0xff]   ;;  %v979_v39 = vld [vmem:[%s1175_s1 + $0x90] sm:$0xff]   ;;  %v980_v40 = vld [vmem:[%s1175_s1 + $0x88] sm:$0xff]  }
  0x14   : > { %v354_v25 = vshll.u32 %v327_v21, 16  ;;  %v981_v41 = vld [vmem:[%s1175_s1 + $0x80] sm:$0xff]   ;;  %v558_v43 = vrot.slane %v327_v21, 1 }
  0x15   : > { %892 = vmatpush3.bf16.msra.mxu0 %v962_v5  ;;  %v347_v23 = vshrl.u32 %v310_v20, 16  ;;  %v349_v24 = vshll.u32 %v310_v20, 16  ;;  %v557_v42 = vrot.slane %v310_v20, 1  ;;  %v855_v55 = vld [vmem:[%s1176_s2] ss:$0 sm:$0xff] }
  0x16   : > { %912 = vmatpush3.bf16.msra.mxu1 %v963_v6  ;;  %893 = vmatprep.subr.bf16.mxu0 %v990_v1  ;;  %v356_v30 = vrot.slane %v354_v25, 1 }
  0x17   : > { %913 = vmatprep.subr.bf16.mxu1 %v990_v1  ;;  %v351_v27 = vrot.slane %v349_v24, 1  ;;  %v559_v44 = vsel %vm556_vm6, %v557_v42, %v558_v43 }
  0x19   : > { %894 = vmatpush3.bf16.msra.mxu0 %v964_v7  ;;  %v352_v29 = vor.u32 %v351_v27, %v347_v23 }
  0x1a   : > { %914 = vmatpush3.bf16.msra.mxu1 %v965_v8  ;;  %895 = vmatprep.subr.bf16.mxu0 %v990_v1 }
  0x1b   : > { %915 = vmatprep.subr.bf16.mxu1 %v990_v1  ;;  %v357_v32 = vsel %vm345_vm2, %v352_v29, %v356_v30 }
  0x1d   : > { %896 = vmatpush3.bf16.msra.mxu0 %v966_v9 }
  0x1e   : > { %916 = vmatpush3.bf16.msra.mxu1 %v967_v10  ;;  %897 = vmatprep.subr.bf16.mxu0 %v990_v1 }
  0x1f   : > { %917 = vmatprep.subr.bf16.mxu1 %v990_v1 }
  0x21   : > { %898 = vmatpush3.bf16.msra.mxu0 %v968_v15 }
  0x22   : > { %918 = vmatpush3.bf16.msra.mxu1 %v969_v16  ;;  %899 = vmatprep.subr.bf16.mxu0 %v990_v1 }
  0x23   : > { %919 = vmatprep.subr.bf16.mxu1 %v990_v1 }
  0x25   : > { %900 = vmatpush3.bf16.msra.mxu0 %v970_v22 }
  0x26   : > { %920 = vmatpush3.bf16.msra.mxu1 %v971_v26  ;;  %901 = vmatprep.subr.bf16.mxu0 %v990_v1 }
  0x27   : > { %921 = vmatprep.subr.bf16.mxu1 %v990_v1 }
  0x29   : > { %902 = vmatpush3.bf16.msra.mxu0 %v972_v28 }
  0x2a   : > { %922 = vmatpush3.bf16.msra.mxu1 %v973_v31  ;;  %927 = vmatprep.subr.bf16.mxu0 %v990_v1 }
  0x2c   : > { %904 = vmatmul.mubr.bf16.vlgmr.msra.gmra.mxu0 %v357_v32 }
  0x2d   : > { %924 = vmatmul.mubr.msk.bf16.vlgmr.msra.gmra.mxu1 %vm828_vm5, %v829_v33  ;;  %928 = vmatpush3.bf16.msra.mxu0 %v974_v34 }
  0x2e   : > { %929 = vmatprep.subr.bf16.mxu0 %v990_v1  ;;  %943 = vmatprep.mubr.msk.bf16.mxu0 %vm991_vm0, %v990_v1 }
  0x31   : > { %930 = vmatpush3.bf16.msra.mxu0 %v975_v35 }
  0x32   : > { %931 = vmatprep.subr.bf16.mxu0 %v990_v1 }
  0x35   : > { %932 = vmatpush3.bf16.msra.mxu0 %v976_v36 }
  0x36   : > { %933 = vmatprep.subr.bf16.mxu0 %v990_v1 }
  0x39   : > { %934 = vmatpush3.bf16.msra.mxu0 %v977_v37 }
  0x3a   : > { %935 = vmatprep.subr.bf16.mxu0 %v990_v1 }
  0x3d   : > { %936 = vmatpush3.bf16.msra.mxu0 %v978_v38 }
  0x3e   : > { %937 = vmatprep.subr.bf16.mxu0 %v990_v1 }
  0x41   : > { %938 = vmatpush3.bf16.msra.mxu0 %v979_v39 }
  0x42   : > { %939 = vmatprep.subr.bf16.mxu0 %v990_v1 }
  0x45   : > { %940 = vmatpush3.bf16.msra.mxu0 %v980_v40 }
  0x46   : > { %941 = vmatprep.subr.bf16.mxu0 %v990_v1 }
  0x49   : > { %942 = vmatpush3.bf16.msra.mxu0 %v981_v41 }
  0x4c   : > { %944 = vmatmul.mubr.bf16.vlgmr.msra.gmra.mxu0 %v559_v44 }
  0xec   : > { %v441_v45 = vpop.f32.mrf.mxu0 }
  0xed   : > { %v530_v46 = vpop.f32.mrf.mxu1 }
  0xee   : > { %v905_v47 = vpop.f32.mrf.mxu0  ;;  %v531_v53 = vadd.f32 %v530_v46, %v441_v45 }
  0xef   : > { %v925_v48 = vpop.f32.mrf.mxu1 }
  0xf0   : > { %v444_v49 = vpop.f32.mrf.mxu0 }
  0xf1   : > { %v533_v50 = vpop.f32.mrf.mxu1 }
  0xf2   : > { %v906_v51 = vpop.f32.mrf.mxu0  ;;  %v534_v58 = vadd.f32 %v533_v50, %v444_v49 }
  0xf3   : > { %v926_v52 = vpop.f32.mrf.mxu1 }
 0x10c   : > { %v643_v54 = vpop.f32.mrf.mxu0 }
 0x10d   : > { %v650_v56 = vadd.f32 %v643_v54, %v531_v53 }
 0x10e   : > { %v945_v57 = vpop.f32.mrf.mxu0 }
 0x10f   : > { %v659_v59 = vadd.f32 %v855_v55, %v650_v56 }
 0x110   : > { %v646_v60 = vpop.f32.mrf.mxu0 }
 0x111   : > { %661 = vst [vmem:[%s289_s12] sm:$0xff] %v659_v59  ;;  %v651_v61 = vadd.f32 %v646_v60, %v534_v58  ;;  %v671_v0 = vmul.f32 %v659_v59, %v659_v59 }
 0x112   : > { %v946_v62 = vpop.f32.mrf.mxu0 }
 0x113   : > { %v660_v63 = vadd.f32 %v855_v55, %v651_v61 }
 0x115   : > { %662 = vst [vmem:[%s289_s12 + $0x8] sm:$0xff] %v660_v63  ;;  %v663_v1 = vadd.f32 %v660_v63, %v659_v59  ;;  %v672_v2 = vmul.f32 %v660_v63, %v660_v63 }
 0x117   : > { %v664_v3 = vrot.slane %v663_v1, 4  ;;  %v673_v4 = vadd.f32 %v672_v2, %v671_v0 }
 0x119   : > { %v665_v5 = vadd.f32 %v664_v3, %v663_v1  ;;  %v674_v6 = vrot.slane %v673_v4, 4 }
 0x11b   : > { %v666_v7 = vrot.slane %v665_v5, 2  ;;  %v675_v8 = vadd.f32 %v674_v6, %v673_v4 }
 0x11d   : > { %v667_v9 = vadd.f32 %v666_v7, %v665_v5  ;;  %v676_v10 = vrot.slane %v675_v8, 2 }
 0x11f   : > { %v668_v11 = vrot.slane %v667_v9, 1  ;;  %v677_v12 = vadd.f32 %v676_v10, %v675_v8 }
 0x121   : > { %v669_v13 = vadd.f32 %v668_v11, %v667_v9  ;;  %v678_v14 = vrot.slane %v677_v12, 1 }
 0x123   : > { %670 = vst [vmem:[%s292_s14] sm:$0x1] %v669_v13  ;;  %v679_v15 = vadd.f32 %v678_v14, %v677_v12 }
 0x125   : > { %680 = vst [vmem:[%s295_s18] sm:$0x1] %v679_v15 }
 0x126 PF: > { %s18_s24 = sadd.s32 1, %s988_s24  }
 0x127   : > { %p15_p4 = scmp.ge.s32.totalorder %s18_s24, 4  }
 0x129   :  { %17 = sbr.rel (!%p15_p4) target bundleno = 1 (0x1), region = 96 }

// kernel: tile.58
= control target key start
LH: loop header
LB: loop body
LE: loop exit
PB: predicated region body
PF: predicated region fallthrough
CT: control target
= control target key end

     0   :  { %s133_s10 = smov 120   ;;  %s134_s11 = smov 104   ;;  %vm3_vm0 = vcmask 64512   ;;  %vm9_vm1 = vcmask 1048512   ;;  %vm15_vm2 = vcmask 982912   ;;  %vm21_vm3 = vcmask 917312   ;;  %s209_s0 = inlined_call_operand.vmem [shape: f32[16,8], index: 0, kind: input, shape index: {}]   ;;  %s210_s1 = inlined_call_operand.vmem [shape: f32[1,1,128], index: 1, kind: output, shape index: {}]  }
   0x1   :  { %v103_v0 = vld [vmem:[%s209_s0 + $0xf] sm:$0x1]   ;;  %v105_v1 = vld [vmem:[%s209_s0 + $0xd] sm:$0x1]   ;;  %v104_v2 = vld [vmem:[%s209_s0 + $0xe] sm:$0x1]  }
   0x2   :  { %7 = vrot.lane.b32.xlu0 %v103_v0, %s133_s10  ;;  %19 = vrot.lane.b32.xlu1 %v105_v1, %s134_s11  ;;  %v106_v3 = vld [vmem:[%s209_s0 + $0xc] sm:$0x1]   ;;  %s135_s16 = smov 112   ;;  %s136_s17 = smov 96   ;;  %v107_v4 = vld [vmem:[%s209_s0 + $0xb] sm:$0x1]  }
   0x3   :  { %v108_v5 = vld [vmem:[%s209_s0 + $0xa] sm:$0x1]   ;;  %v2_v6 = vld [vmem:[%s209_s0] sm:$0x1]   ;;  %s137_s24 = smov 88   ;;  %s138_s25 = smov 80  }
   0x4   :  { %4 = vst.msk [vmem:[#allocation0] sm:$0x1] %vm3_vm0, %v2_v6   ;;  %v109_v7 = vld [vmem:[%s209_s0 + $0x9] sm:$0x1]   ;;  %v110_v8 = vld [vmem:[%s209_s0 + $0x8] sm:$0x1]  }
   0x5   :  { %s139_s30 = smov 72   ;;  %s140_s2 = smov 64   ;;  %v111_v9 = vld [vmem:[%s209_s0 + $0x7] sm:$0x1]   ;;  %v112_v10 = vld [vmem:[%s209_s0 + $0x6] sm:$0x1]  }
   0x6   :  { %13 = vrot.lane.b32.xlu0 %v104_v2, %s135_s16  ;;  %25 = vrot.lane.b32.xlu1 %v106_v3, %s136_s17  ;;  %s141_s7 = smov 56   ;;  %s142_s8 = smov 48   ;;  %v113_v11 = vld [vmem:[%s209_s0 + $0x5] sm:$0x1]   ;;  %v114_v12 = vld [vmem:[%s209_s0 + $0x4] sm:$0x1]  }
   0x7   :  { %s143_s13 = smov 40   ;;  %s144_s14 = smov 32   ;;  %v115_v13 = vld [vmem:[%s209_s0 + $0x3] sm:$0x1]   ;;  %v116_v14 = vld [vmem:[%s209_s0 + $0x2] sm:$0x1]  }
   0x8   :  { %s145_s19 = smov 24   ;;  %s146_s20 = smov 16   ;;  %v117_v15 = vld [vmem:[%s209_s0 + $0x1] sm:$0x1]   ;;  %vm27_vm4 = vcmask 851712   ;;  %vm33_vm5 = vcmask 786112  }
   0x9   :  { %s147_s0 = smov 8   ;;  %vm39_vm6 = vcmask 720512   ;;  %vm45_vm7 = vcmask 654912   ;;  %vm51_vm8 = vcmask 589312   ;;  %vm57_vm9 = vcmask 523712  }
   0xa   :  { %31 = vrot.lane.b32.xlu0 %v107_v4, %s137_s24  ;;  %37 = vrot.lane.b32.xlu1 %v108_v5, %s138_s25  ;;  %vm63_vm10 = vcmask 458112   ;;  %vm69_vm11 = vcmask 392512   ;;  %vm75_vm12 = vcmask 326912   ;;  %vm81_vm13 = vcmask 261312  }
   0xb   :  { %vm87_vm14 = vcmask 195712   ;;  %vm93_vm15 = vcmask 130112  }
   0xe   :  { %43 = vrot.lane.b32.xlu0 %v109_v7, %s139_s30  ;;  %49 = vrot.lane.b32.xlu1 %v110_v8, %s140_s2 }
  0x12   :  { %55 = vrot.lane.b32.xlu0 %v111_v9, %s141_s7  ;;  %61 = vrot.lane.b32.xlu1 %v112_v10, %s142_s8 }
  0x16   :  { %67 = vrot.lane.b32.xlu0 %v113_v11, %s143_s13  ;;  %73 = vrot.lane.b32.xlu1 %v114_v12, %s144_s14 }
  0x1a   :  { %79 = vrot.lane.b32.xlu0 %v115_v13, %s145_s19  ;;  %85 = vrot.lane.b32.xlu1 %v116_v14, %s146_s20 }
  0x1e   :  { %91 = vrot.lane.b32.xlu0 %v117_v15, %s147_s0 }
  0x74   :  { %v8_v16 = vpop.permute.xlu0 %7   ;;  %v20_v17 = vpop.permute.xlu1 %19  }
  0x75   :  { %10 = vst.msk [vmem:[#allocation0] sm:$0x1] %vm9_vm1, %v8_v16  }
  0x78   :  { %v14_v18 = vpop.permute.xlu0 %13   ;;  %v26_v19 = vpop.permute.xlu1 %25  }
  0x79   :  { %16 = vst.msk [vmem:[#allocation0] sm:$0x1] %vm15_vm2, %v14_v18  }
  0x7a   :  { %22 = vst.msk [vmem:[#allocation0] sm:$0x1] %vm21_vm3, %v20_v17  }
  0x7b   :  { %28 = vst.msk [vmem:[#allocation0] sm:$0x1] %vm27_vm4, %v26_v19  }
  0x7c   :  { %v32_v20 = vpop.permute.xlu0 %31   ;;  %v38_v21 = vpop.permute.xlu1 %37  }
  0x7d   :  { %34 = vst.msk [vmem:[#allocation0] sm:$0x1] %vm33_vm5, %v32_v20  }
  0x7e   :  { %40 = vst.msk [vmem:[#allocation0] sm:$0x1] %vm39_vm6, %v38_v21  }
  0x80   :  { %v44_v22 = vpop.permute.xlu0 %43   ;;  %v50_v23 = vpop.permute.xlu1 %49  }
  0x81   :  { %46 = vst.msk [vmem:[#allocation0] sm:$0x1] %vm45_vm7, %v44_v22  }
  0x82   :  { %52 = vst.msk [vmem:[#allocation0] sm:$0x1] %vm51_vm8, %v50_v23  }
  0x84   :  { %v56_v24 = vpop.permute.xlu0 %55   ;;  %v62_v25 = vpop.permute.xlu1 %61  }
  0x85   :  { %58 = vst.msk [vmem:[#allocation0] sm:$0x1] %vm57_vm9, %v56_v24  }
  0x86   :  { %64 = vst.msk [vmem:[#allocation0] sm:$0x1] %vm63_vm10, %v62_v25  }
  0x88   :  { %v68_v26 = vpop.permute.xlu0 %67   ;;  %v74_v27 = vpop.permute.xlu1 %73  }
  0x89   :  { %70 = vst.msk [vmem:[#allocation0] sm:$0x1] %vm69_vm11, %v68_v26  }
  0x8a   :  { %76 = vst.msk [vmem:[#allocation0] sm:$0x1] %vm75_vm12, %v74_v27  }
  0x8c   :  { %v80_v28 = vpop.permute.xlu0 %79   ;;  %v86_v29 = vpop.permute.xlu1 %85  }
  0x8d   :  { %82 = vst.msk [vmem:[#allocation0] sm:$0x1] %vm81_vm13, %v80_v28  }
  0x8e   :  { %88 = vst.msk [vmem:[#allocation0] sm:$0x1] %vm87_vm14, %v86_v29  }
  0x90   :  { %v92_v30 = vpop.permute.xlu0 %91  }
  0x91   :  { %94 = vst.msk [vmem:[#allocation0] sm:$0x1] %vm93_vm15, %v92_v30  }
  0x98   :  { %v99_v31 = vld [vmem:[#allocation0] sm:$0x1] }
  0x99   :  { %102 = vst [vmem:[%s210_s1] sm:$0x1] %v99_v31 }

// kernel: up_forward.5
= control target key start
LH: loop header
LB: loop body
LE: loop exit
PB: predicated region body
PF: predicated region fallthrough
CT: control target
= control target key end

     0   :  { %s301_s12 = smov 0   ;;  %s318_s0 = inlined_call_operand.vmem [shape: f32[2,16,128], index: 0, kind: input, shape index: {}]   ;;  %s319_s1 = inlined_call_operand.vmem [shape: f32[1,1,128], index: 1, kind: input, shape index: {}]   ;;  %s320_s2 = inlined_call_operand.vmem [shape: f32[1,1,128], index: 2, kind: input, shape index: {}]   ;;  %s321_s3 = inlined_call_operand.vmem [shape: f32[2,16,128], index: 3, kind: output, shape index: {}]  }
   0x1 LB: > { %s250_s13 = sadd.s32 4294967295, %s279_s12   ;;  %p254_p0 = scmp.ge.s32.totalorder %s279_s12, 1  ;;  %s279_s12 = sphi %s301_s12, %s13_s12  }
   0x2   : > { %p137_p1 = scmp.lt.s32.totalorder %s279_s12, 3 }
   0x4   : > { %p138_p2 = pnand %p254_p0, %p137_p1 }
   0x5   : > { %p161_p3 = scmp.lt.s32.totalorder (!%p138_p2), %s250_s13, 1 }
   0x6   : > { %141 = sbr.rel (%p138_p2) target bundleno = 22 (0x16), region = 32 }
   0xb   : > { %s323_s13 = smov (!%p161_p3, %s250_s13), 1  ;;  %v259_v0 = vld [vmem:[%s319_s1] ss:$0 sm:$0xff] }
   0xc   : > { %s263_s14 = sshll.u32 %s323_s13, 4  ;;  %v260_v3 = vld [vmem:[%s320_s2] ss:$0 sm:$0xff] }
   0xd   : > { %s165_s19 = scalar_lea.vmem %s318_s0, %s263_s14  ;;  %s170_s24 = scalar_lea.vmem %s321_s3, %s263_s14 }
   0xe   : > { %v171_v1 = vld [vmem:[%s165_s19] sm:$0xff]  ;;  %v172_v2 = vld [vmem:[%s165_s19 + $0x8] sm:$0xff] }
   0xf   : > { %v180_v4 = vmul.f32 %v259_v0, %v171_v1  ;;  %v181_v5 = vmul.f32 %v259_v0, %v172_v2 }
  0x11   : > { %v189_v6 = vadd.f32 %v260_v3, %v180_v4  ;;  %v190_v7 = vadd.f32 %v260_v3, %v181_v5 }
  0x13   : > { %v191_v8 = vmax.f32 %v189_v6, 0.0  ;;  %v192_v9 = vmax.f32 %v190_v7, 0.0 }
  0x15   : > { %193 = vst [vmem:[%s170_s24] sm:$0xff] %v191_v8  ;;  %194 = vst [vmem:[%s170_s24 + $0x8] sm:$0xff] %v192_v9 }
  0x16 PF: > { %s13_s12 = sadd.s32 1, %s279_s12  }
  0x17   : > { %p10_p4 = scmp.ge.s32.totalorder %s13_s12, 4  }
  0x19   :  { %12 = sbr.rel (!%p10_p4) target bundleno = 1 (0x1), region = 62 }

// kernel: up_forward.4
= control target key start
LH: loop header
LB: loop body
LE: loop exit
PB: predicated region body
PF: predicated region fallthrough
CT: control target
= control target key end

     0   :  { %s1055_s24 = smov 0   ;;  %s1202_s0 = inlined_call_operand.vmem [shape: f32[2,16,128], index: 0, kind: input, shape index: {}]   ;;  %s1203_s1 = inlined_call_operand.vmem [shape: bf16[3,128,128], index: 1, kind: input, shape index: {}]   ;;  %s1204_s2 = inlined_call_operand.vmem [shape: f32[1,128], index: 2, kind: input, shape index: {}]   ;;  %s1205_s3 = inlined_call_operand.vmem [shape: f32[1,128], index: 3, kind: input, shape index: {}]   ;;  %s1206_s4 = inlined_call_operand.vmem [shape: f32[1,128], index: 4, kind: input, shape index: {}]   ;;  %s1207_s5 = inlined_call_operand.vmem [shape: f32[2,16,128], index: 5, kind: output, shape index: {0}]   ;;  %s1208_s6 = inlined_call_operand.vmem [shape: f32[2,1,128], index: 6, kind: output, shape index: {1}]   ;;  %s1209_s7 = inlined_call_operand.vmem [shape: f32[2,1,128], index: 7, kind: output, shape index: {2}]  }
   0x1 LB: > { %s806_s25 = sadd.s32 4294967295, %s1010_s24   ;;  %p810_p0 = scmp.ge.s32.totalorder %s1010_s24, 1  ;;  %s1010_s24 = sphi %s1055_s24, %s18_s24  }
   0x2   : > { %p242_p1 = scmp.lt.s32.totalorder %s1010_s24, 3 }
   0x4   : > { %p243_p2 = pnand %p810_p0, %p242_p1 }
   0x5   : > { %p280_p3 = scmp.lt.s32.totalorder (!%p243_p2), %s806_s25, 1 }
   0x6   : > { %246 = sbr.rel (%p243_p2) target bundleno = 294 (0x126), region = 40 }
   0xb   : > { %v980_v0 = vld [vmem:[%s1203_s1 + $0x78] sm:$0xff]   ;;  %v1012_v1 = vmov 0.0   ;;  %v982_v3 = vld [vmem:[%s1203_s1 + $0x70] sm:$0xff]   ;;  %vm1013_vm0 = vmmov 0   ;;  %v984_v5 = vld [vmem:[%s1203_s1 + $0x68] sm:$0xff]   ;;  %s1211_s25 = smov (!%p280_p3, %s806_s25), 1 }
   0xc   : > { %909 = vmatprep.subr.bf16.mxu0 %v1012_v1  ;;  %929 = vmatprep.subr.bf16.mxu1 %v1012_v1  ;;  %v981_v2 = vld [vmem:[%s1203_s1 + $0x38] sm:$0xff]   ;;  %v983_v4 = vld [vmem:[%s1203_s1 + $0x30] sm:$0xff]   ;;  %v985_v6 = vld [vmem:[%s1203_s1 + $0x28] sm:$0xff]   ;;  %s880_s17 = sshll.u32 %s1211_s25, 4  ;;  %vm321_vm1 = vcmask 1040384   ;;  %vm1014_vm4 = vmmov 1   ;;  %s292_s27 = scalar_lea.vmem %s1208_s6, %s1211_s25 }
   0xd   : > { %910 = vmatpush3.bf16.msra.mxu0 %v980_v0  ;;  %925 = vmatprep.mubr.msk.bf16.mxu0 %vm1013_vm0, %v1012_v1  ;;  %v986_v7 = vld [vmem:[%s1203_s1 + $0x60] sm:$0xff]   ;;  %s284_s22 = scalar_lea.vmem %s1202_s0, %s880_s17  ;;  %v988_v9 = vld [vmem:[%s1203_s1 + $0x58] sm:$0xff]   ;;  %v990_v17 = vld [vmem:[%s1203_s1 + $0x50] sm:$0xff]   ;;  %vm365_vm3 = vsmask.f32 7424  ;;  %vm576_vm6 = vcmask 1046528   ;;  %s289_s23 = scalar_lea.vmem %s1207_s5, %s880_s17 }
   0xe   : > { %930 = vmatpush3.bf16.msra.mxu1 %v981_v2  ;;  %911 = vmatprep.subr.bf16.mxu0 %v1012_v1  ;;  %v987_v8 = vld [vmem:[%s1203_s1 + $0x20] sm:$0xff]   ;;  %v989_v10 = vld [vmem:[%s1203_s1 + $0x18] sm:$0xff]   ;;  %v298_v12 = vld [vmem:[%s284_s22 + $0x8] sm:$0xff]  ;;  %s295_s30 = scalar_lea.vmem %s1209_s7, %s1211_s25 }
   0xf   : > { %931 = vmatprep.subr.bf16.mxu1 %v1012_v1  ;;  %945 = vmatprep.mubr.msk.bf16.mxu1 %vm1013_vm0, %v1012_v1  ;;  %v297_v11 = vld [vmem:[%s284_s22] sm:$0xff]  ;;  %v991_v18 = vld [vmem:[%s1203_s1 + $0x10] sm:$0xff]   ;;  %v992_v23 = vld [vmem:[%s1203_s1 + $0x48] sm:$0xff]  }
  0x10   : > { %v815_v13 = vld [vmem:[%s1205_s3] ss:$0 sm:$0xff]  ;;  %v993_v24 = vld [vmem:[%s1203_s1 + $0x8] sm:$0xff]   ;;  %vm849_vm2 = vmneg %vm321_vm1 }
  0x11   : > { %912 = vmatpush3.bf16.msra.mxu0 %v982_v3  ;;  %v306_v14 = vmul.f32 %v815_v13, %v297_v11  ;;  %v307_v15 = vmul.f32 %v815_v13, %v298_v12  ;;  %v816_v16 = vld [vmem:[%s1206_s4] ss:$0 sm:$0xff]  ;;  %vm850_vm5 = vmpackc.low %vm1014_vm4, %vm849_vm2  ;;  %v996_v41 = vld [vmem:[%s1203_s1 + $0xb8] sm:$0xff]  }
  0x12   : > { %932 = vmatpush3.bf16.msra.mxu1 %v983_v4  ;;  %913 = vmatprep.subr.bf16.mxu0 %v1012_v1  ;;  %v994_v30 = vld [vmem:[%s1203_s1 + $0x40] sm:$0xff]   ;;  %v997_v43 = vld [vmem:[%s1203_s1 + $0xb0] sm:$0xff]   ;;  %v998_v44 = vld [vmem:[%s1203_s1 + $0xa8] sm:$0xff]  }
  0x13   : > { %933 = vmatprep.subr.bf16.mxu1 %v1012_v1  ;;  %v315_v19 = vadd.f32 %v816_v16, %v306_v14  ;;  %v316_v20 = vadd.f32 %v816_v16, %v307_v15  ;;  %v995_v33 = vld [vmem:[%s1203_s1] sm:$0xff]   ;;  %v1000_v46 = vld [vmem:[%s1203_s1 + $0x98] sm:$0xff]   ;;  %v1001_v47 = vld [vmem:[%s1203_s1 + $0x90] sm:$0xff]  }
  0x14   : > { %v999_v45 = vld [vmem:[%s1203_s1 + $0xa0] sm:$0xff]   ;;  %v1002_v48 = vld [vmem:[%s1203_s1 + $0x88] sm:$0xff]  }
  0x15   : > { %914 = vmatpush3.bf16.msra.mxu0 %v984_v5  ;;  %v317_v21 = vmax.f32 %v315_v19, 0.0  ;;  %v318_v22 = vmax.f32 %v316_v20, 0.0  ;;  %v1003_v49 = vld [vmem:[%s1203_s1 + $0x80] sm:$0xff]  }
  0x16   : > { %934 = vmatpush3.bf16.msra.mxu1 %v985_v6  ;;  %915 = vmatprep.subr.bf16.mxu0 %v1012_v1  ;;  %v877_v63 = vld [vmem:[%s1204_s2] ss:$0 sm:$0xff] }
  0x17   : > { %935 = vmatprep.subr.bf16.mxu1 %v1012_v1  ;;  %v322_v25 = vrot.slane %v317_v21, 7  ;;  %v323_v26 = vrot.slane %v318_v22, 7 }
  0x19   : > { %916 = vmatpush3.bf16.msra.mxu0 %v986_v7  ;;  %v324_v27 = vsel %vm321_vm1, %v322_v25, %v323_v26  ;;  %v328_v28 = vsel %vm321_vm1, 0.0, %v322_v25  ;;  %v329_v29 = vsel %vm321_vm1, %v323_v26, 0.0 }
  0x1a   : > { %936 = vmatpush3.bf16.msra.mxu1 %v987_v8  ;;  %917 = vmatprep.subr.bf16.mxu0 %v1012_v1  ;;  %v330_v31 = vpack.c.bf16 %v324_v27, %v328_v28  ;;  %v347_v32 = vpack.c.bf16 %v329_v29, %v329_v29  ;;  %v851_v39 = vpack.c.bf16 %v324_v27, %v322_v25 }
  0x1b   : > { %937 = vmatprep.subr.bf16.mxu1 %v1012_v1 }
  0x1c   : > { %v367_v34 = vshrl.u32 %v330_v31, 16  ;;  %v369_v35 = vshll.u32 %v330_v31, 16  ;;  %v374_v36 = vshll.u32 %v347_v32, 16  ;;  %v577_v50 = vrot.slane %v330_v31, 1 }
  0x1d   : > { %918 = vmatpush3.bf16.msra.mxu0 %v988_v9  ;;  %v578_v51 = vrot.slane %v347_v32, 1 }
  0x1e   : > { %938 = vmatpush3.bf16.msra.mxu1 %v989_v10  ;;  %919 = vmatprep.subr.bf16.mxu0 %v1012_v1  ;;  %v371_v37 = vrot.slane %v369_v35, 1  ;;  %v376_v38 = vrot.slane %v374_v36, 1 }
  0x1f   : > { %939 = vmatprep.subr.bf16.mxu1 %v1012_v1  ;;  %v579_v52 = vsel %vm576_vm6, %v577_v50, %v578_v51 }
  0x20   : > { %v372_v40 = vor.u32 %v371_v37, %v367_v34 }
  0x21   : > { %920 = vmatpush3.bf16.msra.mxu0 %v990_v17 }
  0x22   : > { %940 = vmatpush3.bf16.msra.mxu1 %v991_v18  ;;  %921 = vmatprep.subr.bf16.mxu0 %v1012_v1  ;;  %v377_v42 = vsel %vm365_vm3, %v372_v40, %v376_v38 }
  0x23   : > { %941 = vmatprep.subr.bf16.mxu1 %v1012_v1 }
  0x25   : > { %922 = vmatpush3.bf16.msra.mxu0 %v992_v23 }
  0x26   : > { %942 = vmatpush3.bf16.msra.mxu1 %v993_v24  ;;  %923 = vmatprep.subr.bf16.mxu0 %v1012_v1 }
  0x27   : > { %943 = vmatprep.subr.bf16.mxu1 %v1012_v1 }
  0x29   : > { %924 = vmatpush3.bf16.msra.mxu0 %v994_v30 }
  0x2a   : > { %944 = vmatpush3.bf16.msra.mxu1 %v995_v33  ;;  %949 = vmatprep.subr.bf16.mxu0 %v1012_v1 }
  0x2c   : > { %926 = vmatmul.mubr.bf16.vlgmr.msra.gmra.mxu0 %v377_v42 }
  0x2d   : > { %946 = vmatmul.mubr.msk.bf16.vlgmr.msra.gmra.mxu1 %vm850_vm5, %v851_v39  ;;  %950 = vmatpush3.bf16.msra.mxu0 %v996_v41 }
  0x2e   : > { %965 = vmatprep.mubr.msk.bf16.mxu0 %vm1013_vm0, %v1012_v1  ;;  %951 = vmatprep.subr.bf16.mxu0 %v1012_v1 }
  0x31   : > { %952 = vmatpush3.bf16.msra.mxu0 %v997_v43 }
  0x32   : > { %953 = vmatprep.subr.bf16.mxu0 %v1012_v1 }
  0x35   : > { %954 = vmatpush3.bf16.msra.mxu0 %v998_v44 }
  0x36   : > { %955 = vmatprep.subr.bf16.mxu0 %v1012_v1 }
  0x39   : > { %956 = vmatpush3.bf16.msra.mxu0 %v999_v45 }
  0x3a   : > { %957 = vmatprep.subr.bf16.mxu0 %v1012_v1 }
  0x3d   : > { %958 = vmatpush3.bf16.msra.mxu0 %v1000_v46 }
  0x3e   : > { %959 = vmatprep.subr.bf16.mxu0 %v1012_v1 }
  0x41   : > { %960 = vmatpush3.bf16.msra.mxu0 %v1001_v47 }
  0x42   : > { %961 = vmatprep.subr.bf16.mxu0 %v1012_v1 }
  0x45   : > { %962 = vmatpush3.bf16.msra.mxu0 %v1002_v48 }
  0x46   : > { %963 = vmatprep.subr.bf16.mxu0 %v1012_v1 }
  0x49   : > { %964 = vmatpush3.bf16.msra.mxu0 %v1003_v49 }
  0x4c   : > { %966 = vmatmul.mubr.bf16.vlgmr.msra.gmra.mxu0 %v579_v52 }
  0xec   : > { %v461_v54 = vpop.f32.mrf.mxu0 }
  0xed   : > { %v550_v53 = vpop.f32.mrf.mxu1 }
  0xee   : > { %v927_v56 = vpop.f32.mrf.mxu0  ;;  %v551_v61 = vadd.f32 %v550_v53, %v461_v54 }
  0xef   : > { %v947_v55 = vpop.f32.mrf.mxu1 }
  0xf0   : > { %v464_v58 = vpop.f32.mrf.mxu0 }
  0xf1   : > { %v553_v57 = vpop.f32.mrf.mxu1 }
  0xf2   : > { %v928_v60 = vpop.f32.mrf.mxu0  ;;  %v554_v2 = vadd.f32 %v553_v57, %v464_v58 }
  0xf3   : > { %v948_v59 = vpop.f32.mrf.mxu1 }
 0x10c   : > { %v663_v62 = vpop.f32.mrf.mxu0 }
 0x10d   : > { %v670_v0 = vadd.f32 %v663_v62, %v551_v61 }
 0x10e   : > { %v967_v1 = vpop.f32.mrf.mxu0 }
 0x10f   : > { %v679_v3 = vadd.f32 %v877_v63, %v670_v0 }
 0x110   : > { %v666_v4 = vpop.f32.mrf.mxu0 }
 0x111   : > { %681 = vst [vmem:[%s289_s23] sm:$0xff] %v679_v3  ;;  %v671_v5 = vadd.f32 %v666_v4, %v554_v2  ;;  %v691_v8 = vmul.f32 %v679_v3, %v679_v3 }
 0x112   : > { %v968_v6 = vpop.f32.mrf.mxu0 }
 0x113   : > { %v680_v7 = vadd.f32 %v877_v63, %v671_v5 }
 0x115   : > { %682 = vst [vmem:[%s289_s23 + $0x8] sm:$0xff] %v680_v7  ;;  %v683_v9 = vadd.f32 %v680_v7, %v679_v3  ;;  %v692_v10 = vmul.f32 %v680_v7, %v680_v7 }
 0x117   : > { %v684_v11 = vrot.slane %v683_v9, 4  ;;  %v693_v12 = vadd.f32 %v692_v10, %v691_v8 }
 0x119   : > { %v685_v13 = vadd.f32 %v684_v11, %v683_v9  ;;  %v694_v14 = vrot.slane %v693_v12, 4 }
 0x11b   : > { %v686_v15 = vrot.slane %v685_v13, 2  ;;  %v695_v16 = vadd.f32 %v694_v14, %v693_v12 }
 0x11d   : > { %v687_v17 = vadd.f32 %v686_v15, %v685_v13  ;;  %v696_v18 = vrot.slane %v695_v16, 2 }
 0x11f   : > { %v688_v19 = vrot.slane %v687_v17, 1  ;;  %v697_v20 = vadd.f32 %v696_v18, %v695_v16 }
 0x121   : > { %v689_v21 = vadd.f32 %v688_v19, %v687_v17  ;;  %v698_v22 = vrot.slane %v697_v20, 1 }
 0x123   : > { %690 = vst [vmem:[%s292_s27] sm:$0x1] %v689_v21  ;;  %v699_v23 = vadd.f32 %v698_v22, %v697_v20 }
 0x125   : > { %700 = vst [vmem:[%s295_s30] sm:$0x1] %v699_v23 }
 0x126 PF: > { %s18_s24 = sadd.s32 1, %s1010_s24  }
 0x127   : > { %p15_p4 = scmp.ge.s32.totalorder %s18_s24, 4  }
 0x129   :  { %17 = sbr.rel (!%p15_p4) target bundleno = 1 (0x1), region = 96 }

</bundles_post_ra>
